<compile_context>
chip_gen: v6e
topology: v6e:2x2x1
jax: 0.10.0
libtpu: 0.0.40
codegen_flags: <defaults>
</compile_context>

<pallas_src>
import jax
import jax.numpy as jnp
from jax.experimental import pallas as pl
from jax.experimental.pallas import tpu as pltpu

# Model dims from the PyTorch module: m = 2049, n_0 = int(log2(m - 1)) = 11.
N0, N1, N2, N3 = 11, 100, 100, 4
PAD = 128  # lane-dense width for hidden/output feature dims


def _pad2(a, rows, cols):
    r, c = a.shape
    return jnp.pad(a, ((0, rows - r), (0, cols - c)))


def prepare_params(params):
    """One-time layout prep (call once at init, NOT per forward).

    Pads hidden/output feature dims to 128 lanes and casts weights to bf16.
    Padding is generated here from the unpadded params, so the pad region is
    guaranteed to be exact zeros (required for the ReLU(0+0)=0 invariant).
    """
    return dict(
        w1=_pad2(params["w1"], N0, PAD).astype(jnp.bfloat16),   # (11, 128)
        b1=_pad2(params["b1"], 1, PAD).astype(jnp.float32),
        w2=_pad2(params["w2"], PAD, PAD).astype(jnp.bfloat16),  # (128, 128)
        b2=_pad2(params["b2"], 1, PAD).astype(jnp.float32),
        w3=_pad2(params["w3"], PAD, PAD).astype(jnp.bfloat16),  # (128, 128)
        b3=_pad2(params["b3"], 1, PAD).astype(jnp.float32),
    )


def fizzbuzz_mlp_kernel(x_ref, w1_ref, b1_ref, w2_ref, b2_ref, w3_ref, b3_ref,
                        out_ref):
    """Fused 3-layer MLP on one (tb, 11) batch tile.

    Operands feed the MXU in bf16; accumulation, bias add and ReLU stay f32.
    """
    # Layer 1: Linear + ReLU.  x arrives unpadded (tb, 11); the MXU lowering
    # pads the K=11 contraction internally -- no wrapper-side lane padding.
    x = x_ref[...].astype(w1_ref.dtype)
    h1 = jnp.dot(x, w1_ref[...], preferred_element_type=jnp.float32)
    h1 = jnp.maximum(h1 + b1_ref[...], 0.0)

    # Layer 2: Linear + ReLU (re-cast activations to bf16 to feed the MXU).
    h2 = jnp.dot(h1.astype(w2_ref.dtype), w2_ref[...],
                 preferred_element_type=jnp.float32)
    h2 = jnp.maximum(h2 + b2_ref[...], 0.0)

    # Layer 3: Linear (logits, no activation) -> lane-dense (tb, 128) slab.
    logits = jnp.dot(h2.astype(w3_ref.dtype), w3_ref[...],
                     preferred_element_type=jnp.float32)
    out_ref[...] = (logits + b3_ref[...]).astype(out_ref.dtype)


def fizzbuzz_forward(x, padded_params, *, num_batch_tiles=1,
                     out_dtype=jnp.float32):
    """x: (B, n_0) float; padded_params: output of prepare_params().

    num_batch_tiles: 1 for v5e/v6e (single TensorCore -> one big tile, no
    per-step overhead); 2 on v7x so both TensorCores get a tile.
    out_dtype: jnp.bfloat16 halves the output writeback (useful on v5e) if
    downstream consumers tolerate bf16 logits.
    """
    B, n0 = x.shape
    assert n0 == N0
    x = x.astype(jnp.float32)

    # One batch tile per grid step; each tile a multiple of 8 sublanes.
    nt = max(1, int(num_batch_tiles))
    tb = ((pl.cdiv(B, nt) + 7) // 8) * 8
    bp = tb * nt
    if bp != B:
        x = jnp.pad(x, ((0, bp - B), (0, 0)))

    w1, b1 = padded_params["w1"], padded_params["b1"]
    w2, b2 = padded_params["w2"], padded_params["b2"]
    w3, b3 = padded_params["w3"], padded_params["b3"]

    const = lambda shape: pl.BlockSpec(shape, lambda i: (0, 0))

    out_bytes = jnp.dtype(out_dtype).itemsize
    flops = 2 * bp * (N0 * PAD + PAD * PAD + PAD * PAD)
    bytes_accessed = (bp * N0 * 4                      # x (f32, unpadded lanes)
                      + N0 * PAD * 2                   # w1 (bf16)
                      + 2 * PAD * PAD * 2              # w2, w3 (bf16)
                      + 3 * PAD * 4                    # biases (f32)
                      + bp * PAD * out_bytes)          # output slab

    out = pl.pallas_call(
        fizzbuzz_mlp_kernel,
        out_shape=jax.ShapeDtypeStruct((bp, PAD), out_dtype),
        grid=(nt,),
        in_specs=[
            pl.BlockSpec((tb, N0), lambda i: (i, 0)),   # x: batch-tiled, unpadded lanes
            const((N0, PAD)), const((1, PAD)),          # w1, b1 (VMEM-resident)
            const((PAD, PAD)), const((1, PAD)),         # w2, b2 (VMEM-resident)
            const((PAD, PAD)), const((1, PAD)),         # w3, b3 (VMEM-resident)
        ],
        out_specs=pl.BlockSpec((tb, PAD), lambda i: (i, 0)),
        compiler_params=pltpu.CompilerParams(
            dimension_semantics=("parallel",)),
        cost_estimate=pl.CostEstimate(
            flops=flops, transcendentals=0, bytes_accessed=bytes_accessed),
    )(x, w1, b1, w2, b2, w3, b3)

    return out[:B, :N3]


def init_params(key, n_0, n_1, n_2, n_3):
    """Deterministic init mimicking torch.nn.Linear (uniform +-1/sqrt(fan_in))."""
    ks = jax.random.split(key, 6)

    def linear(kw, kb, fan_in, fan_out):
        bound = 1.0 / jnp.sqrt(jnp.float32(fan_in))
        w = jax.random.uniform(kw, (fan_in, fan_out), jnp.float32,
                               minval=-bound, maxval=bound)
        b = jax.random.uniform(kb, (1, fan_out), jnp.float32,
                               minval=-bound, maxval=bound)
        return w, b

    w1, b1 = linear(ks[0], ks[1], n_0, n_1)
    w2, b2 = linear(ks[2], ks[3], n_1, n_2)
    w3, b3 = linear(ks[4], ks[5], n_2, n_3)
    return dict(w1=w1, b1=b1, w2=w2, b2=b2, w3=w3, b3=b3)


def reference_forward(x, p):
    """Pure-JAX reference mirroring the kernel numerics (bf16 operands, f32 math).

    Note: this (and the kernel) differs from a pure-f32 PyTorch forward at the
    ~1e-2 level due to bf16 weights/activations -- acceptable for FizzBuzz.
    """
    f = lambda a: a.astype(jnp.bfloat16).astype(jnp.float32)
    h1 = jnp.maximum(f(x) @ f(p["w1"]) + p["b1"], 0.0)
    h2 = jnp.maximum(f(h1) @ f(p["w2"]) + p["b2"], 0.0)
    return f(h2) @ f(p["w3"]) + p["b3"]


if __name__ == "__main__":
    key = jax.random.PRNGKey(0)
    k_params, k_x = jax.random.split(key)

    params = init_params(k_params, N0, N1, N2, N3)
    # Hoisted one-time weight layout prep (perf feedback: no per-call pad/cast).
    padded_params = jax.block_until_ready(prepare_params(params))

    # Small deterministic batch consistent with the module: one training batch
    # of becth_size=128 rows of n_0=11 binary-bit features.
    B = 128
    x = jax.random.bernoulli(k_x, 0.5, (B, N0)).astype(jnp.float32)

    out = jax.block_until_ready(fizzbuzz_forward(x, padded_params))
    ref = reference_forward(x, params)

    assert out.shape == (B, N3)
    assert jnp.allclose(out, ref, atol=1e-3, rtol=1e-3), float(
        jnp.max(jnp.abs(out - ref)))
    print("KERNEL_OK")
</pallas_src>

<mosaic_0001>
module attributes {stable_mosaic.version = 11 : i64} {
  func.func @fizzbuzz_mlp_kernel(%arg0: i32, %arg1: memref<128x11xf32, #tpu.memory_space<vmem>>, %arg2: memref<11x128xbf16, #tpu.memory_space<vmem>>, %arg3: memref<1x128xf32, #tpu.memory_space<vmem>>, %arg4: memref<128x128xbf16, #tpu.memory_space<vmem>>, %arg5: memref<1x128xf32, #tpu.memory_space<vmem>>, %arg6: memref<128x128xbf16, #tpu.memory_space<vmem>>, %arg7: memref<1x128xf32, #tpu.memory_space<vmem>>, %arg8: memref<128x128xf32, #tpu.memory_space<vmem>>) attributes {dimension_semantics = [#tpu.dimension_semantics<parallel>], iteration_bounds = array<i64: 1>, scalar_prefetch = 0 : i64, scratch_operands = 0 : i64, tpu.core_type = #tpu.core_type<tc>, window_params = [{transform_indices = @transform_0, window_bounds = array<i64: 128, 11>}, {pipeline_mode = #tpu.pipeline_mode<synchronous>, transform_indices = @transform_1, window_bounds = array<i64: 11, 128>}, {pipeline_mode = #tpu.pipeline_mode<synchronous>, transform_indices = @transform_2, window_bounds = array<i64: 1, 128>}, {pipeline_mode = #tpu.pipeline_mode<synchronous>, transform_indices = @transform_3, window_bounds = array<i64: 128, 128>}, {pipeline_mode = #tpu.pipeline_mode<synchronous>, transform_indices = @transform_4, window_bounds = array<i64: 1, 128>}, {pipeline_mode = #tpu.pipeline_mode<synchronous>, transform_indices = @transform_5, window_bounds = array<i64: 128, 128>}, {pipeline_mode = #tpu.pipeline_mode<synchronous>, transform_indices = @transform_6, window_bounds = array<i64: 1, 128>}, {transform_indices = @transform_7, window_bounds = array<i64: 128, 128>}]} {
    %c0 = arith.constant 0 : index
    %c0_0 = arith.constant 0 : index
    %0 = vector.load %arg1[%c0, %c0_0] : memref<128x11xf32, #tpu.memory_space<vmem>>, vector<128x11xf32>
    %1 = arith.truncf %0 : vector<128x11xf32> to vector<128x11xbf16>
    %c0_1 = arith.constant 0 : index
    %c0_2 = arith.constant 0 : index
    %2 = vector.load %arg2[%c0_1, %c0_2] : memref<11x128xbf16, #tpu.memory_space<vmem>>, vector<11x128xbf16>
    %cst = arith.constant dense<0.000000e+00> : vector<128x128xf32>
    %3 = tpu.matmul %1, %2, %cst {dimension_numbers = #tpu.dot_dimension_numbers<[1], [0], [0], [1], [0, 0, 1, 1], [], []>} : vector<128x11xbf16>, vector<11x128xbf16>, vector<128x128xf32> -> vector<128x128xf32>
    %c0_3 = arith.constant 0 : index
    %c0_4 = arith.constant 0 : index
    %4 = vector.load %arg3[%c0_3, %c0_4] : memref<1x128xf32, #tpu.memory_space<vmem>>, vector<1x128xf32>
    %5 = vector.broadcast %4 : vector<1x128xf32> to vector<128x128xf32>
    %6 = arith.addf %3, %5 : vector<128x128xf32>
    %cst_5 = arith.constant 0.000000e+00 : f32
    %7 = vector.broadcast %cst_5 : f32 to vector<128x128xf32>
    %8 = arith.maximumf %6, %7 : vector<128x128xf32>
    %9 = arith.truncf %8 : vector<128x128xf32> to vector<128x128xbf16>
    %c0_6 = arith.constant 0 : index
    %c0_7 = arith.constant 0 : index
    %10 = vector.load %arg4[%c0_6, %c0_7] : memref<128x128xbf16, #tpu.memory_space<vmem>>, vector<128x128xbf16>
    %cst_8 = arith.constant dense<0.000000e+00> : vector<128x128xf32>
    %11 = tpu.matmul %9, %10, %cst_8 {dimension_numbers = #tpu.dot_dimension_numbers<[1], [0], [0], [1], [0, 0, 1, 1], [], []>} : vector<128x128xbf16>, vector<128x128xbf16>, vector<128x128xf32> -> vector<128x128xf32>
    %c0_9 = arith.constant 0 : index
    %c0_10 = arith.constant 0 : index
    %12 = vector.load %arg5[%c0_9, %c0_10] : memref<1x128xf32, #tpu.memory_space<vmem>>, vector<1x128xf32>
    %13 = vector.broadcast %12 : vector<1x128xf32> to vector<128x128xf32>
    %14 = arith.addf %11, %13 : vector<128x128xf32>
    %cst_11 = arith.constant 0.000000e+00 : f32
    %15 = vector.broadcast %cst_11 : f32 to vector<128x128xf32>
    %16 = arith.maximumf %14, %15 : vector<128x128xf32>
    %17 = arith.truncf %16 : vector<128x128xf32> to vector<128x128xbf16>
    %c0_12 = arith.constant 0 : index
    %c0_13 = arith.constant 0 : index
    %18 = vector.load %arg6[%c0_12, %c0_13] : memref<128x128xbf16, #tpu.memory_space<vmem>>, vector<128x128xbf16>
    %cst_14 = arith.constant dense<0.000000e+00> : vector<128x128xf32>
    %19 = tpu.matmul %17, %18, %cst_14 {dimension_numbers = #tpu.dot_dimension_numbers<[1], [0], [0], [1], [0, 0, 1, 1], [], []>} : vector<128x128xbf16>, vector<128x128xbf16>, vector<128x128xf32> -> vector<128x128xf32>
    %c0_15 = arith.constant 0 : index
    %c0_16 = arith.constant 0 : index
    %20 = vector.load %arg7[%c0_15, %c0_16] : memref<1x128xf32, #tpu.memory_space<vmem>>, vector<1x128xf32>
    %21 = vector.broadcast %20 : vector<1x128xf32> to vector<128x128xf32>
    %22 = arith.addf %19, %21 : vector<128x128xf32>
    %c0_17 = arith.constant 0 : index
    %c0_18 = arith.constant 0 : index
    %23 = vector.load %arg8[%c0_17, %c0_18] : memref<128x128xf32, #tpu.memory_space<vmem>>, vector<128x128xf32>
    tpu.vector_store %arg8[%c0_17, %c0_18], %22 {strides = array<i32>} : memref<128x128xf32, #tpu.memory_space<vmem>>, vector<128x128xf32>,
    return
  }
  func.func @transform_0(%arg0: i32) -> (i32, i32) {
    %c0_i32 = arith.constant 0 : i32
    %c0_i32_0 = arith.constant 0 : i32
    return %arg0, %c0_i32 : i32, i32
  }
  func.func @transform_1(%arg0: i32) -> (i32, i32) {
    %c0_i32 = arith.constant 0 : i32
    %c0_i32_0 = arith.constant 0 : i32
    %c0_i32_1 = arith.constant 0 : i32
    return %c0_i32, %c0_i32_0 : i32, i32
  }
  func.func @transform_2(%arg0: i32) -> (i32, i32) {
    %c0_i32 = arith.constant 0 : i32
    %c0_i32_0 = arith.constant 0 : i32
    %c0_i32_1 = arith.constant 0 : i32
    return %c0_i32, %c0_i32_0 : i32, i32
  }
  func.func @transform_3(%arg0: i32) -> (i32, i32) {
    %c0_i32 = arith.constant 0 : i32
    %c0_i32_0 = arith.constant 0 : i32
    %c0_i32_1 = arith.constant 0 : i32
    return %c0_i32, %c0_i32_0 : i32, i32
  }
  func.func @transform_4(%arg0: i32) -> (i32, i32) {
    %c0_i32 = arith.constant 0 : i32
    %c0_i32_0 = arith.constant 0 : i32
    %c0_i32_1 = arith.constant 0 : i32
    return %c0_i32, %c0_i32_0 : i32, i32
  }
  func.func @transform_5(%arg0: i32) -> (i32, i32) {
    %c0_i32 = arith.constant 0 : i32
    %c0_i32_0 = arith.constant 0 : i32
    %c0_i32_1 = arith.constant 0 : i32
    return %c0_i32, %c0_i32_0 : i32, i32
  }
  func.func @transform_6(%arg0: i32) -> (i32, i32) {
    %c0_i32 = arith.constant 0 : i32
    %c0_i32_0 = arith.constant 0 : i32
    %c0_i32_1 = arith.constant 0 : i32
    return %c0_i32, %c0_i32_0 : i32, i32
  }
  func.func @transform_7(%arg0: i32) -> (i32, i32) {
    %c0_i32 = arith.constant 0 : i32
    %c0_i32_0 = arith.constant 0 : i32
    return %arg0, %c0_i32 : i32, i32
  }
}

</mosaic_0001>

<bundles_post_ra>
// kernel: tpu_custom_call.1
= control target key start
LH: loop header
LB: loop body
LE: loop exit
PB: predicated region body
PF: predicated region fallthrough
CT: control target
= control target key end

     0   :  { %vm91_vm0 = vcmask 1044480   ;;  %vm92_vm1 = vcmask 1045504   ;;  %vm66_vm2 = vcmask 89088   ;;  %v805_v3 = vmov 65535   ;;  %s968_s0 = inlined_call_operand.vmem [shape: f32[128,11], index: 0, kind: input, shape index: {}]   ;;  %s969_s1 = inlined_call_operand.vmem [shape: bf16[11,128], index: 1, kind: input, shape index: {}]   ;;  %s970_s2 = inlined_call_operand.vmem [shape: f32[1,128], index: 2, kind: input, shape index: {}]   ;;  %s971_s3 = inlined_call_operand.vmem [shape: bf16[128,128], index: 3, kind: input, shape index: {}]   ;;  %s972_s4 = inlined_call_operand.vmem [shape: f32[1,128], index: 4, kind: input, shape index: {}]   ;;  %s973_s5 = inlined_call_operand.vmem [shape: bf16[128,128], index: 5, kind: input, shape index: {}]   ;;  %s974_s6 = inlined_call_operand.vmem [shape: f32[1,128], index: 6, kind: input, shape index: {}]   ;;  %s975_s7 = inlined_call_operand.hbm [shape: f32[128,128], index: 7, kind: output, shape index: {}]  }
   0x1   :  { %v766_v0 = vld [vmem:[%s969_s1] sm:$0x3f]   ;;  %v29_v2 = vld [vmem:[%s968_s0 + $0x8] sm:$0xff]  ;;  %v93_v4 = vsel %vm91_vm0, 4294967295, %v805_v3  ;;  %v30_v7 = vld [vmem:[%s968_s0 + $0x10] sm:$0xff] }
   0x2   :  { %v28_v1 = vld [vmem:[%s968_s0] sm:$0xff]  ;;  %v94_v6 = vsel %vm92_vm1, %v93_v4, 0  ;;  %v31_v8 = vld [vmem:[%s968_s0 + $0x18] sm:$0xff]  ;;  %v33_v11 = vld [vmem:[%s968_s0 + $0x28] sm:$0xff] }
   0x3   :  { %v44_v5 = vpack.c.bf16 %v29_v2, %v28_v1  ;;  %v96_v9 = vand.u32 %v766_v0, %v94_v6  ;;  %v32_v10 = vld [vmem:[%s968_s0 + $0x20] sm:$0xff]  ;;  %v45_v12 = vpack.c.bf16 %v31_v8, %v30_v7  ;;  %v767_v14 = vld [vmem:[%s971_s3 + $0x38] sm:$0xff]   ;;  %v768_v15 = vld [vmem:[%s971_s3 + $0x30] sm:$0xff]  }
   0x4   :  { %v46_v13 = vpack.c.bf16 %v33_v11, %v32_v10  ;;  %v34_v16 = vld [vmem:[%s968_s0 + $0x30] sm:$0xff]  ;;  %v35_v17 = vld [vmem:[%s968_s0 + $0x38] sm:$0xff]  ;;  %698 = vmatprep.subr.bf16.mxu1 %v767_v14  ;;  %v36_v18 = vld [vmem:[%s968_s0 + $0x40] sm:$0xff] }
   0x5   :  { %682 = vmatprep.mubr.msk.bf16.mxu0 %vm66_vm2, %v44_v5  ;;  %680 = vmatprep.subr.bf16.mxu0 %v96_v9  ;;  %v37_v19 = vld [vmem:[%s968_s0 + $0x48] sm:$0xff]  ;;  %v770_v21 = vld [vmem:[%s971_s3 + $0x20] sm:$0xff]   ;;  %v47_v22 = vpack.c.bf16 %v35_v17, %v34_v16  ;;  %v38_v24 = vld [vmem:[%s968_s0 + $0x50] sm:$0xff] }
   0x6   :  { %681 = vmatpush3.bf16.msra.mxu0 %v96_v9  ;;  %699 = vmatpush3.bf16.msra.mxu1 %v767_v14  ;;  %v769_v20 = vld [vmem:[%s971_s3 + $0x28] sm:$0xff]   ;;  %v48_v23 = vpack.c.bf16 %v37_v19, %v36_v18  ;;  %v39_v25 = vld [vmem:[%s968_s0 + $0x58] sm:$0xff] }
   0x7   :  { %700 = vmatprep.subr.bf16.mxu1 %v768_v15  ;;  %v771_v26 = vld [vmem:[%s971_s3 + $0x18] sm:$0xff]  }
   0x9   :  { %683 = vmatmul.mubr.msk.bf16.vlgmr.msra.gmra.mxu0 %vm66_vm2, %v45_v12 }
   0xa   :  { %686 = vmatprep.mubr.msk.bf16.mxu0 %vm66_vm2, %v46_v13  ;;  %701 = vmatpush3.bf16.msra.mxu1 %v768_v15 }
   0xb   :  { %702 = vmatprep.subr.bf16.mxu1 %v769_v20 }
   0xe   :  { %703 = vmatpush3.bf16.msra.mxu1 %v769_v20 }
   0xf   :  { %704 = vmatprep.subr.bf16.mxu1 %v770_v21 }
  0x11   :  { %687 = vmatmul.mubr.msk.bf16.gmra.mxu0 %vm66_vm2, %v47_v22 }
  0x12   :  { %690 = vmatprep.mubr.msk.bf16.mxu0 %vm66_vm2, %v48_v23 }
  0x13   :  { %12 = vsyncpa [#allocation3], 0  ;;  %v40_v27 = vld [vmem:[%s968_s0 + $0x60] sm:$0xff]  ;;  %v41_v28 = vld [vmem:[%s968_s0 + $0x68] sm:$0xff]  ;;  %v49_v29 = vpack.c.bf16 %v39_v25, %v38_v24  ;;  %705 = vmatpush3.bf16.msra.mxu1 %v770_v21 }
  0x14   :  { %v50_v30 = vpack.c.bf16 %v41_v28, %v40_v27  ;;  %706 = vmatprep.subr.bf16.mxu1 %v771_v26  ;;  %v42_v31 = vld [vmem:[%s968_s0 + $0x70] sm:$0xff]  ;;  %v43_v32 = vld [vmem:[%s968_s0 + $0x78] sm:$0xff]  ;;  %v773_v35 = vld [vmem:[%s971_s3 + $0x8] sm:$0xff]  }
  0x15   :  { %v51_v33 = vpack.c.bf16 %v43_v32, %v42_v31  ;;  %v772_v34 = vld [vmem:[%s971_s3 + $0x10] sm:$0xff]   ;;  %v774_v36 = vld [vmem:[%s971_s3] sm:$0xff]   ;;  %v775_v37 = vld [vmem:[%s973_s5 + $0x38] sm:$0xff]  }
  0x16   :  { %v776_v38 = vld [vmem:[%s973_s5 + $0x30] sm:$0xff]   ;;  %730 = vmatprep.subr.bf16.mxu0 %v775_v37  ;;  %v777_v39 = vld [vmem:[%s973_s5 + $0x28] sm:$0xff]   ;;  %v778_v40 = vld [vmem:[%s973_s5 + $0x20] sm:$0xff]  }
  0x17   :  { %707 = vmatpush3.bf16.msra.mxu1 %v771_v26  ;;  %731 = vmatpush3.bf16.msra.mxu0 %v775_v37  ;;  %v779_v41 = vld [vmem:[%s973_s5 + $0x18] sm:$0xff]   ;;  %v611_v44 = vld [vmem:[%s970_s2] ss:$0 sm:$0xff] }
  0x18   :  { %708 = vmatprep.subr.bf16.mxu1 %v772_v34  ;;  %732 = vmatprep.subr.bf16.mxu0 %v776_v38  ;;  %v782_v37 = vld [vmem:[%s973_s5] sm:$0xff]  }
  0x19   :  { %691 = vmatmul.mubr.msk.bf16.gmra.mxu0 %vm66_vm2, %v49_v29 }
  0x1a   :  { %694 = vmatprep.mubr.msk.bf16.mxu0 %vm66_vm2, %v50_v30 }
  0x1b   :  { %709 = vmatpush3.bf16.msra.mxu1 %v772_v34  ;;  %733 = vmatpush3.bf16.msra.mxu0 %v776_v38 }
  0x1c   :  { %710 = vmatprep.subr.bf16.mxu1 %v773_v35  ;;  %734 = vmatprep.subr.bf16.mxu0 %v777_v39 }
  0x1f   :  { %711 = vmatpush3.bf16.msra.mxu1 %v773_v35  ;;  %735 = vmatpush3.bf16.msra.mxu0 %v777_v39  ;;  %v780_v35 = vld [vmem:[%s973_s5 + $0x10] sm:$0xff]  }
  0x20   :  { %712 = vmatprep.subr.bf16.mxu1 %v774_v36  ;;  %736 = vmatprep.subr.bf16.mxu0 %v778_v40 }
  0x21   :  { %695 = vmatmul.mubr.msk.bf16.gmra.mxu0 %vm66_vm2, %v51_v33 }
  0x23   :  { %713 = vmatpush3.bf16.msra.mxu1 %v774_v36  ;;  %737 = vmatpush3.bf16.msra.mxu0 %v778_v40  ;;  %v781_v36 = vld [vmem:[%s973_s5 + $0x8] sm:$0xff]   ;;  %v621_v40 = vld [vmem:[%s972_s4] ss:$0 sm:$0xff] }
  0x24   :  { %738 = vmatprep.subr.bf16.mxu0 %v779_v41 }
  0x27   :  { %739 = vmatpush3.bf16.msra.mxu0 %v779_v41 }
  0x28   :  { %740 = vmatprep.subr.bf16.mxu0 %v780_v35 }
  0x2b   :  { %741 = vmatpush3.bf16.msra.mxu0 %v780_v35 }
  0x2c   :  { %742 = vmatprep.subr.bf16.mxu0 %v781_v36 }
  0x2f   :  { %743 = vmatpush3.bf16.msra.mxu0 %v781_v36 }
  0x30   :  { %744 = vmatprep.subr.bf16.mxu0 %v782_v37 }
  0x33   :  { %745 = vmatpush3.bf16.msra.mxu0 %v782_v37 }
  0xc9   :  { %v684_v42 = vpop.f32.mrf.mxu0 }
  0xca   :  { %v141_v48 = vadd.f32 %v684_v42, %v611_v44 }
  0xcb   :  { %v132_v43 = vpop.f32.mrf.mxu0 }
  0xcc   :  { %v133_v46 = vadd.f32 %v611_v44, %v132_v43  ;;  %v197_v55 = vmax.f32 %v141_v48, 0.0 }
  0xcd   :  { %v685_v45 = vpop.f32.mrf.mxu0 }
  0xce   :  { %v144_v47 = vadd.f32 %v685_v45, %v611_v44  ;;  %v195_v53 = vmax.f32 %v133_v46, 0.0 }
  0xcf   :  { %v135_v49 = vpop.f32.mrf.mxu0 }
  0xd0   :  { %v136_v50 = vadd.f32 %v611_v44, %v135_v49  ;;  %v198_v51 = vmax.f32 %v144_v47, 0.0 }
  0xd1   :  { %v688_v52 = vpop.f32.mrf.mxu0 }
  0xd2   :  { %v196_v54 = vmax.f32 %v136_v50, 0.0  ;;  %v212_v58 = vpack.c.bf16 %v198_v51, %v197_v55  ;;  %v157_v62 = vadd.f32 %v688_v52, %v611_v44 }
  0xd3   :  { %v148_v56 = vpop.f32.mrf.mxu0 }
  0xd4   :  { %v211_v57 = vpack.c.bf16 %v196_v54, %v195_v53  ;;  %v149_v60 = vadd.f32 %v611_v44, %v148_v56  ;;  %v201_v5 = vmax.f32 %v157_v62, 0.0 }
  0xd5   :  { %v689_v59 = vpop.f32.mrf.mxu0 }
  0xd6   :  { %v160_v61 = vadd.f32 %v689_v59, %v611_v44  ;;  %714 = vmatprep.mubr.bf16.mxu1 %v211_v57  ;;  %v199_v3 = vmax.f32 %v149_v60, 0.0 }
  0xd7   :  { %v151_v63 = vpop.f32.mrf.mxu0  ;;  %715 = vmatmul.mubr.bf16.vlgmr.msra.gmra.mxu1 %v212_v58 }
  0xd8   :  { %v152_v0 = vadd.f32 %v611_v44, %v151_v63  ;;  %v202_v1 = vmax.f32 %v160_v61, 0.0 }
  0xd9   :  { %v692_v2 = vpop.f32.mrf.mxu0 }
  0xda   :  { %v200_v4 = vmax.f32 %v152_v0, 0.0  ;;  %v214_v8 = vpack.c.bf16 %v202_v1, %v201_v5  ;;  %v173_v12 = vadd.f32 %v692_v2, %v611_v44 }
  0xdb   :  { %v164_v6 = vpop.f32.mrf.mxu0 }
  0xdc   :  { %v213_v7 = vpack.c.bf16 %v200_v4, %v199_v3  ;;  %v165_v10 = vadd.f32 %v611_v44, %v164_v6  ;;  %v205_v19 = vmax.f32 %v173_v12, 0.0 }
  0xdd   :  { %v693_v9 = vpop.f32.mrf.mxu0 }
  0xde   :  { %v176_v11 = vadd.f32 %v693_v9, %v611_v44  ;;  %718 = vmatprep.mubr.bf16.mxu1 %v213_v7  ;;  %v203_v17 = vmax.f32 %v165_v10, 0.0 }
  0xdf   :  { %v167_v13 = vpop.f32.mrf.mxu0  ;;  %719 = vmatmul.mubr.bf16.gmra.mxu1 %v214_v8 }
  0xe0   :  { %v168_v14 = vadd.f32 %v611_v44, %v167_v13  ;;  %v206_v15 = vmax.f32 %v176_v11, 0.0 }
  0xe1   :  { %v696_v16 = vpop.f32.mrf.mxu0 }
  0xe2   :  { %v204_v18 = vmax.f32 %v168_v14, 0.0  ;;  %v216_v22 = vpack.c.bf16 %v206_v15, %v205_v19  ;;  %v189_v26 = vadd.f32 %v696_v16, %v611_v44 }
  0xe3   :  { %v180_v20 = vpop.f32.mrf.mxu0 }
  0xe4   :  { %v215_v21 = vpack.c.bf16 %v204_v18, %v203_v17  ;;  %v181_v24 = vadd.f32 %v611_v44, %v180_v20  ;;  %v209_v32 = vmax.f32 %v189_v26, 0.0 }
  0xe5   :  { %v697_v23 = vpop.f32.mrf.mxu0 }
  0xe6   :  { %v192_v25 = vadd.f32 %v697_v23, %v611_v44  ;;  %722 = vmatprep.mubr.bf16.mxu1 %v215_v21  ;;  %v207_v30 = vmax.f32 %v181_v24, 0.0 }
  0xe7   :  { %v183_v27 = vpop.f32.mrf.mxu0  ;;  %723 = vmatmul.mubr.bf16.gmra.mxu1 %v216_v22 }
  0xe8   :  { %v184_v28 = vadd.f32 %v611_v44, %v183_v27  ;;  %v210_v29 = vmax.f32 %v192_v25, 0.0 }
  0xea   :  { %v208_v31 = vmax.f32 %v184_v28, 0.0  ;;  %v218_v34 = vpack.c.bf16 %v210_v29, %v209_v32 }
  0xec   :  { %v217_v33 = vpack.c.bf16 %v208_v31, %v207_v30  ;;  %v630_v31 = vld [vmem:[%s974_s6] ss:$0 sm:$0xff]  ;;  %s806_s6 = smov [#allocation2]  }
  0xed   :  { %s600_s19 = sshll.u32 %s806_s6, 4  ;;  %s601_s19 = int_to_ptr.vmem [resolvable:$true] %s600_s19 }
  0xee   :  { %726 = vmatprep.mubr.bf16.mxu1 %v217_v33  ;;  %s783_s20 = scalar_lea.vmem %s601_s19, 2048  ;;  %p788_p1 = scmp.lt.s32.totalorder %s601_s19, %s601_s19 }
  0xef   :  { %727 = vmatmul.mubr.bf16.gmra.mxu1 %v218_v34  ;;  %p784_p0 = scmp.ne.s32.totalorder %s601_s19, %s783_s20  ;;  %p789_p2 = scmp.lt.s32.totalorder %s783_s20, %s783_s20 }
  0xf1   :  { %p790_p3 = por %p789_p2, %p788_p1 }
  0xf3   :  { %p791_p4 = pnand %p790_p3, %p784_p0 }
 0x197   :  { %v716_v38 = vpop.f32.mrf.mxu1 }
 0x198   :  { %v333_v44 = vadd.f32 %v716_v38, %v621_v40 }
 0x199   :  { %v324_v39 = vpop.f32.mrf.mxu1 }
 0x19a   :  { %v325_v42 = vadd.f32 %v621_v40, %v324_v39  ;;  %v389_v51 = vmax.f32 %v333_v44, 0.0 }
 0x19b   :  { %v717_v41 = vpop.f32.mrf.mxu1 }
 0x19c   :  { %v336_v43 = vadd.f32 %v717_v41, %v621_v40  ;;  %v387_v49 = vmax.f32 %v325_v42, 0.0 }
 0x19d   :  { %v327_v45 = vpop.f32.mrf.mxu1 }
 0x19e   :  { %v328_v46 = vadd.f32 %v621_v40, %v327_v45  ;;  %v390_v47 = vmax.f32 %v336_v43, 0.0 }
 0x19f   :  { %v720_v48 = vpop.f32.mrf.mxu1 }
 0x1a0   :  { %v388_v50 = vmax.f32 %v328_v46, 0.0  ;;  %v404_v54 = vpack.c.bf16 %v390_v47, %v389_v51  ;;  %v349_v58 = vadd.f32 %v720_v48, %v621_v40 }
 0x1a1   :  { %v340_v52 = vpop.f32.mrf.mxu1 }
 0x1a2   :  { %v403_v53 = vpack.c.bf16 %v388_v50, %v387_v49  ;;  %v341_v56 = vadd.f32 %v621_v40, %v340_v52  ;;  %v393_v1 = vmax.f32 %v349_v58, 0.0 }
 0x1a3   :  { %v721_v55 = vpop.f32.mrf.mxu1 }
 0x1a4   :  { %v352_v57 = vadd.f32 %v721_v55, %v621_v40  ;;  %746 = vmatprep.mubr.bf16.mxu0 %v403_v53  ;;  %v391_v63 = vmax.f32 %v341_v56, 0.0 }
 0x1a5   :  { %v343_v59 = vpop.f32.mrf.mxu1  ;;  %747 = vmatmul.mubr.bf16.vlgmr.msra.gmra.mxu0 %v404_v54 }
 0x1a6   :  { %v344_v60 = vadd.f32 %v621_v40, %v343_v59  ;;  %v394_v61 = vmax.f32 %v352_v57, 0.0 }
 0x1a7   :  { %v724_v62 = vpop.f32.mrf.mxu1 }
 0x1a8   :  { %v392_v0 = vmax.f32 %v344_v60, 0.0  ;;  %v406_v4 = vpack.c.bf16 %v394_v61, %v393_v1  ;;  %v365_v8 = vadd.f32 %v724_v62, %v621_v40 }
 0x1a9   :  { %v356_v2 = vpop.f32.mrf.mxu1 }
 0x1aa   :  { %v405_v3 = vpack.c.bf16 %v392_v0, %v391_v63  ;;  %v357_v6 = vadd.f32 %v621_v40, %v356_v2  ;;  %v397_v15 = vmax.f32 %v365_v8, 0.0 }
 0x1ab   :  { %v725_v5 = vpop.f32.mrf.mxu1 }
 0x1ac   :  { %v368_v7 = vadd.f32 %v725_v5, %v621_v40  ;;  %750 = vmatprep.mubr.bf16.mxu0 %v405_v3  ;;  %v395_v13 = vmax.f32 %v357_v6, 0.0 }
 0x1ad   :  { %v359_v9 = vpop.f32.mrf.mxu1  ;;  %751 = vmatmul.mubr.bf16.gmra.mxu0 %v406_v4 }
 0x1ae   :  { %v360_v10 = vadd.f32 %v621_v40, %v359_v9  ;;  %v398_v11 = vmax.f32 %v368_v7, 0.0 }
 0x1af   :  { %v728_v12 = vpop.f32.mrf.mxu1 }
 0x1b0   :  { %v396_v14 = vmax.f32 %v360_v10, 0.0  ;;  %v408_v18 = vpack.c.bf16 %v398_v11, %v397_v15  ;;  %v381_v22 = vadd.f32 %v728_v12, %v621_v40 }
 0x1b1   :  { %v372_v16 = vpop.f32.mrf.mxu1 }
 0x1b2   :  { %v407_v17 = vpack.c.bf16 %v396_v14, %v395_v13  ;;  %v373_v20 = vadd.f32 %v621_v40, %v372_v16  ;;  %v401_v28 = vmax.f32 %v381_v22, 0.0 }
 0x1b3   :  { %v729_v19 = vpop.f32.mrf.mxu1 }
 0x1b4   :  { %v384_v21 = vadd.f32 %v729_v19, %v621_v40  ;;  %754 = vmatprep.mubr.bf16.mxu0 %v407_v17  ;;  %v399_v26 = vmax.f32 %v373_v20, 0.0 }
 0x1b5   :  { %v375_v23 = vpop.f32.mrf.mxu1  ;;  %755 = vmatmul.mubr.bf16.gmra.mxu0 %v408_v18 }
 0x1b6   :  { %v376_v24 = vadd.f32 %v621_v40, %v375_v23  ;;  %v402_v25 = vmax.f32 %v384_v21, 0.0 }
 0x1b8   :  { %v400_v27 = vmax.f32 %v376_v24, 0.0  ;;  %v410_v30 = vpack.c.bf16 %v402_v25, %v401_v28 }
 0x1ba   :  { %v409_v29 = vpack.c.bf16 %v400_v27, %v399_v26 }
 0x1bc   :  { %758 = vmatprep.mubr.bf16.mxu0 %v409_v29 }
 0x1bd   :  { %759 = vmatmul.mubr.bf16.gmra.mxu0 %v410_v30 }
 0x265   :  { %v748_v32 = vpop.f32.mrf.mxu0 }
 0x266   :  { %v525_v33 = vadd.f32 %v748_v32, %v630_v31 }
 0x267   :  { %v516_v34 = vpop.f32.mrf.mxu0 }
 0x268   :  { %581 = vst [vmem:[#allocation2 + $0x10] sm:$0xff] %v525_v33  ;;  %v517_v35 = vadd.f32 %v630_v31, %v516_v34 }
 0x269   :  { %v749_v36 = vpop.f32.mrf.mxu0 }
 0x26a   :  { %579 = vst [vmem:[#allocation2] sm:$0xff] %v517_v35  ;;  %v528_v37 = vadd.f32 %v749_v36, %v630_v31 }
 0x26b   :  { %v519_v38 = vpop.f32.mrf.mxu0 }
 0x26c   :  { %582 = vst [vmem:[#allocation2 + $0x18] sm:$0xff] %v528_v37  ;;  %v520_v39 = vadd.f32 %v630_v31, %v519_v38 }
 0x26d   :  { %v752_v40 = vpop.f32.mrf.mxu0 }
 0x26e   :  { %580 = vst [vmem:[#allocation2 + $0x8] sm:$0xff] %v520_v39  ;;  %v541_v41 = vadd.f32 %v752_v40, %v630_v31 }
 0x26f   :  { %v532_v42 = vpop.f32.mrf.mxu0 }
 0x270   :  { %585 = vst [vmem:[#allocation2 + $0x30] sm:$0xff] %v541_v41  ;;  %v533_v43 = vadd.f32 %v630_v31, %v532_v42 }
 0x271   :  { %v753_v44 = vpop.f32.mrf.mxu0 }
 0x272   :  { %583 = vst [vmem:[#allocation2 + $0x20] sm:$0xff] %v533_v43  ;;  %v544_v45 = vadd.f32 %v753_v44, %v630_v31 }
 0x273   :  { %v535_v46 = vpop.f32.mrf.mxu0 }
 0x274   :  { %586 = vst [vmem:[#allocation2 + $0x38] sm:$0xff] %v544_v45  ;;  %v536_v47 = vadd.f32 %v630_v31, %v535_v46 }
 0x275   :  { %v756_v48 = vpop.f32.mrf.mxu0 }
 0x276   :  { %584 = vst [vmem:[#allocation2 + $0x28] sm:$0xff] %v536_v47  ;;  %v557_v49 = vadd.f32 %v756_v48, %v630_v31 }
 0x277   :  { %v548_v50 = vpop.f32.mrf.mxu0 }
 0x278   :  { %589 = vst [vmem:[#allocation2 + $0x50] sm:$0xff] %v557_v49  ;;  %v549_v51 = vadd.f32 %v630_v31, %v548_v50 }
 0x279   :  { %v757_v52 = vpop.f32.mrf.mxu0 }
 0x27a   :  { %587 = vst [vmem:[#allocation2 + $0x40] sm:$0xff] %v549_v51  ;;  %v560_v53 = vadd.f32 %v757_v52, %v630_v31 }
 0x27b   :  { %v551_v54 = vpop.f32.mrf.mxu0 }
 0x27c   :  { %590 = vst [vmem:[#allocation2 + $0x58] sm:$0xff] %v560_v53  ;;  %v552_v55 = vadd.f32 %v630_v31, %v551_v54 }
 0x27d   :  { %v760_v56 = vpop.f32.mrf.mxu0 }
 0x27e   :  { %588 = vst [vmem:[#allocation2 + $0x48] sm:$0xff] %v552_v55  ;;  %v573_v57 = vadd.f32 %v760_v56, %v630_v31 }
 0x27f   :  { %v564_v58 = vpop.f32.mrf.mxu0 }
 0x280   :  { %593 = vst [vmem:[#allocation2 + $0x70] sm:$0xff] %v573_v57  ;;  %v565_v59 = vadd.f32 %v630_v31, %v564_v58 }
 0x281   :  { %v761_v60 = vpop.f32.mrf.mxu0 }
 0x282   :  { %591 = vst [vmem:[#allocation2 + $0x60] sm:$0xff] %v565_v59  ;;  %v576_v61 = vadd.f32 %v761_v60, %v630_v31 }
 0x283   :  { %v567_v62 = vpop.f32.mrf.mxu0 }
 0x284   :  { %594 = vst [vmem:[#allocation2 + $0x78] sm:$0xff] %v576_v61  ;;  %v568_v63 = vadd.f32 %v630_v31, %v567_v62 }
 0x286   :  { %592 = vst [vmem:[#allocation2 + $0x68] sm:$0xff] %v568_v63 }
 0x287   :  { %794 = shalt.err (!%p791_p4)
}
 0x288   :  { %s807_s21 = smov 128   ;;  %s808_s22 = smov 8  }
 0x289   :  { %606 = dma.vmem_to_hbm [thread:$0]  %s601_s19, 2048, %s975_s7, [#allocation3], %s807_s21, %s807_s21, %s808_s22  }
 0x28a   :  { %803 = dma.done.wait [#allocation3], 2048  }
 0x28b   :  { %804 = vsyncadd [#allocation3], 4294965248 }
 0x28c   :  { %610 = vsyncpa [#allocation3], 1 }

</bundles_post_ra>
